<compile_context>
chip_gen: v6e
topology: v6e:2x2x1
jax: 0.10.0
libtpu: 0.0.40
codegen_flags: <defaults>
</compile_context>

<pallas_src>
import functools

import jax
import jax.numpy as jnp
from jax.experimental import pallas as pl
from jax.experimental.pallas import tpu as pltpu


# ----------------------------------------------------------------------------
# Fused attention kernel (one batch element per grid step)
# ----------------------------------------------------------------------------
def _attention_kernel(
    x_ref, cos_ref, sin_ref,
    wq_ref, bq_ref, wk_ref, bk_ref, wv_ref, bv_ref, wo_ref,
    o_ref,
    *, num_heads, num_kv_heads, head_dim, scaling,
):
    S = x_ref.shape[1]
    H, Kv, hd = num_heads, num_kv_heads, head_dim
    G = H // Kv
    half = hd // 2

    x = x_ref[0]                  # (S, hidden) f32
    cos = cos_ref[0]              # (S, hd)
    sin = sin_ref[0]              # (S, hd)

    # ---- QKV projections: three wide matmuls (bias on q/k/v as in the module) ----
    q = jnp.dot(x, wq_ref[...], preferred_element_type=jnp.float32) + bq_ref[...]
    k = jnp.dot(x, wk_ref[...], preferred_element_type=jnp.float32) + bk_ref[...]
    v = jnp.dot(x, wv_ref[...], preferred_element_type=jnp.float32) + bv_ref[...]

    # Fold 1/sqrt(head_dim) into Q (commutes with the linear RoPE transform).
    q = q * scaling

    # ---- head-major 3-D layouts (stack of static lane slices: cheap copies) ----
    q_h = jnp.stack([q[:, h * hd:(h + 1) * hd] for h in range(H)], axis=0)    # (H, S, hd)
    k_h = jnp.stack([k[:, j * hd:(j + 1) * hd] for j in range(Kv)], axis=0)   # (Kv, S, hd)
    v_h = jnp.stack([v[:, j * hd:(j + 1) * hd] for j in range(Kv)], axis=0)   # (Kv, S, hd)

    # ---- RoPE: applied once to all of Q, once to the Kv heads of K ----
    c = cos[None, :, :]
    s = sin[None, :, :]

    def rope(t):  # t: (n_heads, S, hd)
        rot = jnp.concatenate([-t[..., half:], t[..., :half]], axis=-1)   # rotate_half
        return t * c + rot * s

    q_h = rope(q_h)
    k_h = rope(k_h)

    # ---- GQA attention: batch over KV heads; group the G query heads as rows.
    # (H,S,hd) -> (Kv, G*S, hd): row n = g*S + s belongs to query head h = kv*G + g,
    # which (repeat_kv) attends KV head kv.
    q_g = q_h.reshape(Kv, G * S, hd)

    scores = jnp.einsum('knd,ktd->knt', q_g, k_h,
                        preferred_element_type=jnp.float32)               # (Kv, G*S, S)
    m = jnp.max(scores, axis=-1, keepdims=True)
    p = jnp.exp(scores - m)                                               # softmax in f32
    denom = jnp.sum(p, axis=-1, keepdims=True)
    p = p * pl.reciprocal(denom, approx=True)

    ctx = jnp.einsum('knt,ktd->knd', p, v_h,
                     preferred_element_type=jnp.float32)                  # (Kv, G*S, hd)

    # ---- concat heads in order h = kv*G + g, then a single o_proj matmul ----
    ctx = ctx.reshape(H, S, hd)
    ctx2 = jnp.concatenate([ctx[h] for h in range(H)], axis=-1)           # (S, H*hd)
    o_ref[0] = jnp.dot(ctx2, wo_ref[...], preferred_element_type=jnp.float32)


# ----------------------------------------------------------------------------
# Wrapper
# ----------------------------------------------------------------------------
def attention_forward(hidden_states, rotary_pos_emb, params, *, num_heads, num_kv_heads):
    """Pallas forward pass of the Attention module.

    hidden_states:  (B, S, hidden_size) float32
    rotary_pos_emb: (B, S, head_dim // 2) float32  (the `freqs` tensor of the module)
    params: wq (E, H*hd), bq (1, H*hd), wk/wv (E, Kv*hd), bk/bv (1, Kv*hd), wo (H*hd, E)
            -- weights stored as (in, out).
    """
    B, S, E = hidden_states.shape
    hd = E // num_heads
    scaling = float(hd) ** -0.5

    # cos/sin tables matching cos.unsqueeze(1).repeat(1, 1, 1, 2) in the module
    # (the half-dim table is tiled twice along the last axis), computed once host-side.
    cos_half = jnp.cos(rotary_pos_emb.astype(jnp.float32))
    sin_half = jnp.sin(rotary_pos_emb.astype(jnp.float32))
    cos = jnp.concatenate([cos_half, cos_half], axis=-1)   # (B, S, hd)
    sin = jnp.concatenate([sin_half, sin_half], axis=-1)   # (B, S, hd)

    kernel = functools.partial(
        _attention_kernel,
        num_heads=num_heads, num_kv_heads=num_kv_heads, head_dim=hd, scaling=scaling,
    )

    def resident(arr):  # whole-array weight block, constant index -> resident in VMEM
        nd = arr.ndim
        return pl.BlockSpec(arr.shape, lambda b, _nd=nd: (0,) * _nd)

    p = params
    in_specs = [
        pl.BlockSpec((1, S, E), lambda b: (b, 0, 0)),     # hidden_states
        pl.BlockSpec((1, S, hd), lambda b: (b, 0, 0)),    # cos
        pl.BlockSpec((1, S, hd), lambda b: (b, 0, 0)),    # sin
        resident(p["wq"]), resident(p["bq"]),
        resident(p["wk"]), resident(p["bk"]),
        resident(p["wv"]), resident(p["bv"]),
        resident(p["wo"]),
    ]
    out_spec = pl.BlockSpec((1, S, E), lambda b: (b, 0, 0))

    return pl.pallas_call(
        kernel,
        out_shape=jax.ShapeDtypeStruct((B, S, E), jnp.float32),
        grid=(B,),
        in_specs=in_specs,
        out_specs=out_spec,
        compiler_params=pltpu.CompilerParams(
            dimension_semantics=("parallel",),   # batch -> both TensorCores on v7x
        ),
    )(hidden_states.astype(jnp.float32), cos, sin,
      p["wq"], p["bq"], p["wk"], p["bk"], p["wv"], p["bv"], p["wo"])


# ----------------------------------------------------------------------------
# Pure-JAX reference (mirrors the PyTorch module exactly) for validation
# ----------------------------------------------------------------------------
def attention_reference(hidden_states, rotary_pos_emb, params, *, num_heads, num_kv_heads):
    B, S, E = hidden_states.shape
    hd = E // num_heads
    G = num_heads // num_kv_heads
    x = hidden_states.astype(jnp.float32)

    q = x @ params["wq"] + params["bq"]
    k = x @ params["wk"] + params["bk"]
    v = x @ params["wv"] + params["bv"]
    q = q.reshape(B, S, num_heads, hd).transpose(0, 2, 1, 3)
    k = k.reshape(B, S, num_kv_heads, hd).transpose(0, 2, 1, 3)
    v = v.reshape(B, S, num_kv_heads, hd).transpose(0, 2, 1, 3)

    cos = jnp.cos(rotary_pos_emb)
    sin = jnp.sin(rotary_pos_emb)
    cos = jnp.concatenate([cos, cos], axis=-1)[:, None, :, :]   # (B,1,S,hd)
    sin = jnp.concatenate([sin, sin], axis=-1)[:, None, :, :]

    def rot_half(t):
        return jnp.concatenate([-t[..., hd // 2:], t[..., :hd // 2]], axis=-1)

    q = q * cos + rot_half(q) * sin
    k = k * cos + rot_half(k) * sin
    k = jnp.repeat(k, G, axis=1)          # repeat_kv
    v = jnp.repeat(v, G, axis=1)

    scores = jnp.einsum('bhsd,bhtd->bhst', q, k) * (hd ** -0.5)
    w = jax.nn.softmax(scores, axis=-1)
    ctx = jnp.einsum('bhst,bhtd->bhsd', w, v)
    ctx = ctx.transpose(0, 2, 1, 3).reshape(B, S, num_heads * hd)
    return ctx @ params["wo"]


# ----------------------------------------------------------------------------
if __name__ == "__main__":
    hidden_size = 32
    num_heads = 4
    num_kv_heads = 2
    head_dim = hidden_size // num_heads    # 8
    B, S = 2, 8

    key = jax.random.PRNGKey(0)
    k_x, k_q, k_bq, k_k, k_bk, k_v, k_bv, k_o = jax.random.split(key, 8)

    def w(kk, shape, scale=0.05):
        return (scale * jax.random.normal(kk, shape)).astype(jnp.float32)

    params = {
        "wq": w(k_q, (hidden_size, num_heads * head_dim)),
        "bq": w(k_bq, (1, num_heads * head_dim)),
        "wk": w(k_k, (hidden_size, num_kv_heads * head_dim)),
        "bk": w(k_bk, (1, num_kv_heads * head_dim)),
        "wv": w(k_v, (hidden_size, num_kv_heads * head_dim)),
        "bv": w(k_bv, (1, num_kv_heads * head_dim)),
        "wo": w(k_o, (num_heads * head_dim, hidden_size)),
    }

    x = jax.random.normal(k_x, (B, S, hidden_size), dtype=jnp.float32)

    # rotary_pos_emb (freqs): (B, S, head_dim // 2), standard RoPE frequencies
    inv_freq = 1.0 / (10000.0 ** (jnp.arange(0, head_dim, 2, dtype=jnp.float32) / head_dim))
    freqs = jnp.arange(S, dtype=jnp.float32)[:, None] * inv_freq[None, :]      # (S, hd/2)
    rotary_pos_emb = jnp.broadcast_to(freqs[None], (B, S, head_dim // 2))

    out = attention_forward(x, rotary_pos_emb, params,
                            num_heads=num_heads, num_kv_heads=num_kv_heads)
    jax.block_until_ready(out)

    ref = attention_reference(x, rotary_pos_emb, params,
                              num_heads=num_heads, num_kv_heads=num_kv_heads)
    assert out.shape == (B, S, hidden_size)
    assert bool(jnp.all(jnp.isfinite(out)))
    # loose tolerance accounts for the approximate EUP reciprocal in the softmax
    assert bool(jnp.allclose(out, ref, rtol=2e-2, atol=2e-3)), \
        float(jnp.max(jnp.abs(out - ref)))
    print("KERNEL_OK")
</pallas_src>

<mosaic_0001>
module attributes {stable_mosaic.version = 11 : i64} {
  func.func @_attention_kernel(%arg0: i32, %arg1: memref<1x8x32xf32, #tpu.memory_space<vmem>>, %arg2: memref<1x8x8xf32, #tpu.memory_space<vmem>>, %arg3: memref<1x8x8xf32, #tpu.memory_space<vmem>>, %arg4: memref<32x32xf32, #tpu.memory_space<vmem>>, %arg5: memref<1x32xf32, #tpu.memory_space<vmem>>, %arg6: memref<32x16xf32, #tpu.memory_space<vmem>>, %arg7: memref<1x16xf32, #tpu.memory_space<vmem>>, %arg8: memref<32x16xf32, #tpu.memory_space<vmem>>, %arg9: memref<1x16xf32, #tpu.memory_space<vmem>>, %arg10: memref<32x32xf32, #tpu.memory_space<vmem>>, %arg11: memref<1x8x32xf32, #tpu.memory_space<vmem>>) attributes {dimension_semantics = [#tpu.dimension_semantics<parallel>], iteration_bounds = array<i64: 2>, scalar_prefetch = 0 : i64, scratch_operands = 0 : i64, tpu.core_type = #tpu.core_type<tc>, window_params = [{transform_indices = @transform_0, window_bounds = array<i64: 1, 8, 32>}, {transform_indices = @transform_1, window_bounds = array<i64: 1, 8, 8>}, {transform_indices = @transform_2, window_bounds = array<i64: 1, 8, 8>}, {pipeline_mode = #tpu.pipeline_mode<synchronous>, transform_indices = @transform_3, window_bounds = array<i64: 32, 32>}, {pipeline_mode = #tpu.pipeline_mode<synchronous>, transform_indices = @transform_4, window_bounds = array<i64: 1, 32>}, {pipeline_mode = #tpu.pipeline_mode<synchronous>, transform_indices = @transform_5, window_bounds = array<i64: 32, 16>}, {pipeline_mode = #tpu.pipeline_mode<synchronous>, transform_indices = @transform_6, window_bounds = array<i64: 1, 16>}, {pipeline_mode = #tpu.pipeline_mode<synchronous>, transform_indices = @transform_7, window_bounds = array<i64: 32, 16>}, {pipeline_mode = #tpu.pipeline_mode<synchronous>, transform_indices = @transform_8, window_bounds = array<i64: 1, 16>}, {pipeline_mode = #tpu.pipeline_mode<synchronous>, transform_indices = @transform_9, window_bounds = array<i64: 32, 32>}, {transform_indices = @transform_10, window_bounds = array<i64: 1, 8, 32>}]} {
    %c0 = arith.constant 0 : index
    %c0_0 = arith.constant 0 : index
    %c0_1 = arith.constant 0 : index
    %0 = vector.load %arg1[%c0, %c0_0, %c0_1] : memref<1x8x32xf32, #tpu.memory_space<vmem>>, vector<1x8x32xf32>
    %1 = vector.shape_cast %0 : vector<1x8x32xf32> to vector<8x32xf32>
    %c0_2 = arith.constant 0 : index
    %c0_3 = arith.constant 0 : index
    %c0_4 = arith.constant 0 : index
    %2 = vector.load %arg2[%c0_2, %c0_3, %c0_4] : memref<1x8x8xf32, #tpu.memory_space<vmem>>, vector<1x8x8xf32>
    %3 = vector.shape_cast %2 : vector<1x8x8xf32> to vector<8x8xf32>
    %c0_5 = arith.constant 0 : index
    %c0_6 = arith.constant 0 : index
    %c0_7 = arith.constant 0 : index
    %4 = vector.load %arg3[%c0_5, %c0_6, %c0_7] : memref<1x8x8xf32, #tpu.memory_space<vmem>>, vector<1x8x8xf32>
    %5 = vector.shape_cast %4 : vector<1x8x8xf32> to vector<8x8xf32>
    %c0_8 = arith.constant 0 : index
    %c0_9 = arith.constant 0 : index
    %6 = vector.load %arg4[%c0_8, %c0_9] : memref<32x32xf32, #tpu.memory_space<vmem>>, vector<32x32xf32>
    %cst = arith.constant dense<0.000000e+00> : vector<8x32xf32>
    %7 = tpu.matmul %1, %6, %cst {dimension_numbers = #tpu.dot_dimension_numbers<[1], [0], [0], [1], [0, 0, 1, 1], [], []>} : vector<8x32xf32>, vector<32x32xf32>, vector<8x32xf32> -> vector<8x32xf32>
    %c0_10 = arith.constant 0 : index
    %c0_11 = arith.constant 0 : index
    %8 = vector.load %arg5[%c0_10, %c0_11] : memref<1x32xf32, #tpu.memory_space<vmem>>, vector<1x32xf32>
    %9 = vector.broadcast %8 : vector<1x32xf32> to vector<8x32xf32>
    %10 = arith.addf %7, %9 : vector<8x32xf32>
    %c0_12 = arith.constant 0 : index
    %c0_13 = arith.constant 0 : index
    %11 = vector.load %arg6[%c0_12, %c0_13] : memref<32x16xf32, #tpu.memory_space<vmem>>, vector<32x16xf32>
    %cst_14 = arith.constant dense<0.000000e+00> : vector<8x16xf32>
    %12 = tpu.matmul %1, %11, %cst_14 {dimension_numbers = #tpu.dot_dimension_numbers<[1], [0], [0], [1], [0, 0, 1, 1], [], []>} : vector<8x32xf32>, vector<32x16xf32>, vector<8x16xf32> -> vector<8x16xf32>
    %c0_15 = arith.constant 0 : index
    %c0_16 = arith.constant 0 : index
    %13 = vector.load %arg7[%c0_15, %c0_16] : memref<1x16xf32, #tpu.memory_space<vmem>>, vector<1x16xf32>
    %14 = vector.broadcast %13 : vector<1x16xf32> to vector<8x16xf32>
    %15 = arith.addf %12, %14 : vector<8x16xf32>
    %c0_17 = arith.constant 0 : index
    %c0_18 = arith.constant 0 : index
    %16 = vector.load %arg8[%c0_17, %c0_18] : memref<32x16xf32, #tpu.memory_space<vmem>>, vector<32x16xf32>
    %cst_19 = arith.constant dense<0.000000e+00> : vector<8x16xf32>
    %17 = tpu.matmul %1, %16, %cst_19 {dimension_numbers = #tpu.dot_dimension_numbers<[1], [0], [0], [1], [0, 0, 1, 1], [], []>} : vector<8x32xf32>, vector<32x16xf32>, vector<8x16xf32> -> vector<8x16xf32>
    %c0_20 = arith.constant 0 : index
    %c0_21 = arith.constant 0 : index
    %18 = vector.load %arg9[%c0_20, %c0_21] : memref<1x16xf32, #tpu.memory_space<vmem>>, vector<1x16xf32>
    %19 = vector.broadcast %18 : vector<1x16xf32> to vector<8x16xf32>
    %20 = arith.addf %17, %19 : vector<8x16xf32>
    %cst_22 = arith.constant 0.353553385 : f32
    %21 = vector.broadcast %cst_22 : f32 to vector<8x32xf32>
    %22 = arith.mulf %10, %21 : vector<8x32xf32>
    %23 = vector.extract_strided_slice %22 {offsets = [0, 0], sizes = [8, 8], strides = [1, 1]} : vector<8x32xf32> to vector<8x8xf32>
    %24 = vector.extract_strided_slice %22 {offsets = [0, 8], sizes = [8, 8], strides = [1, 1]} : vector<8x32xf32> to vector<8x8xf32>
    %25 = vector.extract_strided_slice %22 {offsets = [0, 16], sizes = [8, 8], strides = [1, 1]} : vector<8x32xf32> to vector<8x8xf32>
    %26 = vector.extract_strided_slice %22 {offsets = [0, 24], sizes = [8, 8], strides = [1, 1]} : vector<8x32xf32> to vector<8x8xf32>
    %27 = vector.shape_cast %23 : vector<8x8xf32> to vector<1x8x8xf32>
    %28 = vector.shape_cast %24 : vector<8x8xf32> to vector<1x8x8xf32>
    %29 = vector.shape_cast %25 : vector<8x8xf32> to vector<1x8x8xf32>
    %30 = vector.shape_cast %26 : vector<8x8xf32> to vector<1x8x8xf32>
    %31 = tpu.concatenate %27, %28, %29, %30 in 0 : vector<1x8x8xf32>, vector<1x8x8xf32>, vector<1x8x8xf32>, vector<1x8x8xf32> -> vector<4x8x8xf32>
    %32 = vector.extract_strided_slice %15 {offsets = [0, 0], sizes = [8, 8], strides = [1, 1]} : vector<8x16xf32> to vector<8x8xf32>
    %33 = vector.extract_strided_slice %15 {offsets = [0, 8], sizes = [8, 8], strides = [1, 1]} : vector<8x16xf32> to vector<8x8xf32>
    %34 = vector.shape_cast %32 : vector<8x8xf32> to vector<1x8x8xf32>
    %35 = vector.shape_cast %33 : vector<8x8xf32> to vector<1x8x8xf32>
    %36 = tpu.concatenate %34, %35 in 0 : vector<1x8x8xf32>, vector<1x8x8xf32> -> vector<2x8x8xf32>
    %37 = vector.extract_strided_slice %20 {offsets = [0, 0], sizes = [8, 8], strides = [1, 1]} : vector<8x16xf32> to vector<8x8xf32>
    %38 = vector.extract_strided_slice %20 {offsets = [0, 8], sizes = [8, 8], strides = [1, 1]} : vector<8x16xf32> to vector<8x8xf32>
    %39 = vector.shape_cast %37 : vector<8x8xf32> to vector<1x8x8xf32>
    %40 = vector.shape_cast %38 : vector<8x8xf32> to vector<1x8x8xf32>
    %41 = tpu.concatenate %39, %40 in 0 : vector<1x8x8xf32>, vector<1x8x8xf32> -> vector<2x8x8xf32>
    %42 = vector.shape_cast %3 : vector<8x8xf32> to vector<1x8x8xf32>
    %43 = vector.shape_cast %5 : vector<8x8xf32> to vector<1x8x8xf32>
    %44 = vector.extract_strided_slice %31 {offsets = [0, 0, 4], sizes = [4, 8, 4], strides = [1, 1, 1]} : vector<4x8x8xf32> to vector<4x8x4xf32>
    %cst_23 = arith.constant 0.000000e+00 : f32
    %45 = vector.broadcast %cst_23 : f32 to vector<4x8x4xf32>
    %46 = arith.subf %45, %44 : vector<4x8x4xf32>
    %47 = vector.extract_strided_slice %31 {offsets = [0, 0, 0], sizes = [4, 8, 4], strides = [1, 1, 1]} : vector<4x8x8xf32> to vector<4x8x4xf32>
    %48 = tpu.concatenate %46, %47 in 2 : vector<4x8x4xf32>, vector<4x8x4xf32> -> vector<4x8x8xf32>
    %49 = vector.broadcast %42 : vector<1x8x8xf32> to vector<4x8x8xf32>
    %50 = arith.mulf %31, %49 : vector<4x8x8xf32>
    %51 = vector.broadcast %43 : vector<1x8x8xf32> to vector<4x8x8xf32>
    %52 = arith.mulf %48, %51 : vector<4x8x8xf32>
    %53 = arith.addf %50, %52 : vector<4x8x8xf32>
    %54 = vector.extract_strided_slice %36 {offsets = [0, 0, 4], sizes = [2, 8, 4], strides = [1, 1, 1]} : vector<2x8x8xf32> to vector<2x8x4xf32>
    %cst_24 = arith.constant 0.000000e+00 : f32
    %55 = vector.broadcast %cst_24 : f32 to vector<2x8x4xf32>
    %56 = arith.subf %55, %54 : vector<2x8x4xf32>
    %57 = vector.extract_strided_slice %36 {offsets = [0, 0, 0], sizes = [2, 8, 4], strides = [1, 1, 1]} : vector<2x8x8xf32> to vector<2x8x4xf32>
    %58 = tpu.concatenate %56, %57 in 2 : vector<2x8x4xf32>, vector<2x8x4xf32> -> vector<2x8x8xf32>
    %59 = vector.broadcast %42 : vector<1x8x8xf32> to vector<2x8x8xf32>
    %60 = arith.mulf %36, %59 : vector<2x8x8xf32>
    %61 = vector.broadcast %43 : vector<1x8x8xf32> to vector<2x8x8xf32>
    %62 = arith.mulf %58, %61 : vector<2x8x8xf32>
    %63 = arith.addf %60, %62 : vector<2x8x8xf32>
    %64 = vector.shape_cast %53 : vector<4x8x8xf32> to vector<2x16x8xf32>
    "tpu.trace_start"() <{level = 10 : i32, message = "knd,ktd->knt"}> : () -> ()
    %cst_25 = arith.constant dense<0.000000e+00> : vector<2x16x8xf32>
    %65 = tpu.matmul %64, %63, %cst_25 {dimension_numbers = #tpu.dot_dimension_numbers<[2], [2], [1], [1], [0, 0, 0, 1, 1, 1], [0], [0]>} : vector<2x16x8xf32>, vector<2x8x8xf32>, vector<2x16x8xf32> -> vector<2x16x8xf32>
    "tpu.trace_stop"() : () -> ()
    %cst_26 = arith.constant dense<0xFF800000> : vector<2x16xf32>
    %66 = vector.multi_reduction <maximumf>, %65, %cst_26 [2] : vector<2x16x8xf32> to vector<2x16xf32>
    %67 = vector.shape_cast %66 : vector<2x16xf32> to vector<2x16x1xf32>
    %68 = vector.broadcast %67 : vector<2x16x1xf32> to vector<2x16x8xf32>
    %69 = arith.subf %65, %68 : vector<2x16x8xf32>
    %70 = math.exp %69 : vector<2x16x8xf32>
    %cst_27 = arith.constant dense<0.000000e+00> : vector<2x16xf32>
    %71 = vector.multi_reduction <add>, %70, %cst_27 [2] : vector<2x16x8xf32> to vector<2x16xf32>
    %72 = vector.shape_cast %71 : vector<2x16xf32> to vector<2x16x1xf32>
    %73 = tpu.reciprocal %72 {approx = true} : vector<2x16x1xf32> -> vector<2x16x1xf32>
    %74 = vector.broadcast %73 : vector<2x16x1xf32> to vector<2x16x8xf32>
    %75 = arith.mulf %70, %74 : vector<2x16x8xf32>
    "tpu.trace_start"() <{level = 10 : i32, message = "knt,ktd->knd"}> : () -> ()
    %cst_28 = arith.constant dense<0.000000e+00> : vector<2x16x8xf32>
    %76 = tpu.matmul %75, %41, %cst_28 {dimension_numbers = #tpu.dot_dimension_numbers<[2], [1], [1], [2], [0, 0, 0, 1, 1, 2], [0], [0]>} : vector<2x16x8xf32>, vector<2x8x8xf32>, vector<2x16x8xf32> -> vector<2x16x8xf32>
    "tpu.trace_stop"() : () -> ()
    %77 = vector.shape_cast %76 : vector<2x16x8xf32> to vector<4x8x8xf32>
    %78 = vector.extract_strided_slice %77 {offsets = [0, 0, 0], sizes = [1, 8, 8], strides = [1, 1, 1]} : vector<4x8x8xf32> to vector<1x8x8xf32>
    %79 = vector.shape_cast %78 : vector<1x8x8xf32> to vector<8x8xf32>
    %80 = vector.extract_strided_slice %77 {offsets = [1, 0, 0], sizes = [1, 8, 8], strides = [1, 1, 1]} : vector<4x8x8xf32> to vector<1x8x8xf32>
    %81 = vector.shape_cast %80 : vector<1x8x8xf32> to vector<8x8xf32>
    %82 = vector.extract_strided_slice %77 {offsets = [2, 0, 0], sizes = [1, 8, 8], strides = [1, 1, 1]} : vector<4x8x8xf32> to vector<1x8x8xf32>
    %83 = vector.shape_cast %82 : vector<1x8x8xf32> to vector<8x8xf32>
    %84 = vector.extract_strided_slice %77 {offsets = [3, 0, 0], sizes = [1, 8, 8], strides = [1, 1, 1]} : vector<4x8x8xf32> to vector<1x8x8xf32>
    %85 = vector.shape_cast %84 : vector<1x8x8xf32> to vector<8x8xf32>
    %86 = tpu.concatenate %79, %81, %83, %85 in 1 : vector<8x8xf32>, vector<8x8xf32>, vector<8x8xf32>, vector<8x8xf32> -> vector<8x32xf32>
    %c0_29 = arith.constant 0 : index
    %c0_30 = arith.constant 0 : index
    %87 = vector.load %arg10[%c0_29, %c0_30] : memref<32x32xf32, #tpu.memory_space<vmem>>, vector<32x32xf32>
    %cst_31 = arith.constant dense<0.000000e+00> : vector<8x32xf32>
    %88 = tpu.matmul %86, %87, %cst_31 {dimension_numbers = #tpu.dot_dimension_numbers<[1], [0], [0], [1], [0, 0, 1, 1], [], []>} : vector<8x32xf32>, vector<32x32xf32>, vector<8x32xf32> -> vector<8x32xf32>
    %c0_32 = arith.constant 0 : index
    %c0_33 = arith.constant 0 : index
    %c0_34 = arith.constant 0 : index
    %89 = vector.load %arg11[%c0_32, %c0_33, %c0_34] : memref<1x8x32xf32, #tpu.memory_space<vmem>>, vector<1x8x32xf32>
    %90 = vector.shape_cast %89 : vector<1x8x32xf32> to vector<8x32xf32>
    %91 = vector.shape_cast %88 : vector<8x32xf32> to vector<1x8x32xf32>
    tpu.vector_store %arg11[%c0_32, %c0_33, %c0_34], %91 {strides = array<i32>} : memref<1x8x32xf32, #tpu.memory_space<vmem>>, vector<1x8x32xf32>,
    return
  }
  func.func @transform_0(%arg0: i32) -> (i32, i32, i32) {
    %c0_i32 = arith.constant 0 : i32
    %c0_i32_0 = arith.constant 0 : i32
    %c0_i32_1 = arith.constant 0 : i32
    return %arg0, %c0_i32, %c0_i32_0 : i32, i32, i32
  }
  func.func @transform_1(%arg0: i32) -> (i32, i32, i32) {
    %c0_i32 = arith.constant 0 : i32
    %c0_i32_0 = arith.constant 0 : i32
    %c0_i32_1 = arith.constant 0 : i32
    return %arg0, %c0_i32, %c0_i32_0 : i32, i32, i32
  }
  func.func @transform_2(%arg0: i32) -> (i32, i32, i32) {
    %c0_i32 = arith.constant 0 : i32
    %c0_i32_0 = arith.constant 0 : i32
    %c0_i32_1 = arith.constant 0 : i32
    return %arg0, %c0_i32, %c0_i32_0 : i32, i32, i32
  }
  func.func @transform_3(%arg0: i32) -> (i32, i32) {
    %c0_i32 = arith.constant 0 : i32
    %c0_i32_0 = arith.constant 0 : i32
    %c0_i32_1 = arith.constant 0 : i32
    return %c0_i32, %c0_i32_0 : i32, i32
  }
  func.func @transform_4(%arg0: i32) -> (i32, i32) {
    %c0_i32 = arith.constant 0 : i32
    %c0_i32_0 = arith.constant 0 : i32
    %c0_i32_1 = arith.constant 0 : i32
    return %c0_i32, %c0_i32_0 : i32, i32
  }
  func.func @transform_5(%arg0: i32) -> (i32, i32) {
    %c0_i32 = arith.constant 0 : i32
    %c0_i32_0 = arith.constant 0 : i32
    %c0_i32_1 = arith.constant 0 : i32
    return %c0_i32, %c0_i32_0 : i32, i32
  }
  func.func @transform_6(%arg0: i32) -> (i32, i32) {
    %c0_i32 = arith.constant 0 : i32
    %c0_i32_0 = arith.constant 0 : i32
    %c0_i32_1 = arith.constant 0 : i32
    return %c0_i32, %c0_i32_0 : i32, i32
  }
  func.func @transform_7(%arg0: i32) -> (i32, i32) {
    %c0_i32 = arith.constant 0 : i32
    %c0_i32_0 = arith.constant 0 : i32
    %c0_i32_1 = arith.constant 0 : i32
    return %c0_i32, %c0_i32_0 : i32, i32
  }
  func.func @transform_8(%arg0: i32) -> (i32, i32) {
    %c0_i32 = arith.constant 0 : i32
    %c0_i32_0 = arith.constant 0 : i32
    %c0_i32_1 = arith.constant 0 : i32
    return %c0_i32, %c0_i32_0 : i32, i32
  }
  func.func @transform_9(%arg0: i32) -> (i32, i32) {
    %c0_i32 = arith.constant 0 : i32
    %c0_i32_0 = arith.constant 0 : i32
    %c0_i32_1 = arith.constant 0 : i32
    return %c0_i32, %c0_i32_0 : i32, i32
  }
  func.func @transform_10(%arg0: i32) -> (i32, i32, i32) {
    %c0_i32 = arith.constant 0 : i32
    %c0_i32_0 = arith.constant 0 : i32
    %c0_i32_1 = arith.constant 0 : i32
    return %arg0, %c0_i32, %c0_i32_0 : i32, i32, i32
  }
}

</mosaic_0001>

<bundles_post_ra>
// kernel: tpu_custom_call.1
= control target key start
LH: loop header
LB: loop body
LE: loop exit
PB: predicated region body
PF: predicated region fallthrough
CT: control target
= control target key end

     0   :  { %15 = vsyncpa [#allocation3], 0  ;;  %s1997_s0 = inlined_call_operand.vmem [shape: f32[2,8,32], index: 0, kind: input, shape index: {}]   ;;  %s1998_s1 = inlined_call_operand.vmem [shape: f32[2,8,8], index: 1, kind: input, shape index: {}]   ;;  %s1999_s2 = inlined_call_operand.hbm [shape: f32[2,8,8], index: 2, kind: input, shape index: {}]   ;;  %s2000_s3 = inlined_call_operand.vmem [shape: f32[32,32], index: 3, kind: input, shape index: {}]   ;;  %s2001_s4 = inlined_call_operand.vmem [shape: f32[1,32], index: 4, kind: input, shape index: {}]   ;;  %s2002_s5 = inlined_call_operand.vmem [shape: f32[32,16], index: 5, kind: input, shape index: {}]   ;;  %s2003_s6 = inlined_call_operand.vmem [shape: f32[1,16], index: 6, kind: input, shape index: {}]   ;;  %s2004_s7 = inlined_call_operand.vmem [shape: f32[32,16], index: 7, kind: input, shape index: {}]   ;;  %s2005_s8 = inlined_call_operand.vmem [shape: f32[1,16], index: 8, kind: input, shape index: {}]   ;;  %s2006_s9 = inlined_call_operand.vmem [shape: f32[32,32], index: 9, kind: input, shape index: {}]   ;;  %s2007_s10 = inlined_call_operand.hbm [shape: f32[2,8,32], index: 10, kind: output, shape index: {}]  }
   0x1   :  { %17 = vsyncpa [#allocation3 + $0x1], 0 }
   0x2   :  { %18 = vsyncpa [#allocation4], 0 }
   0x3   :  { %20 = vsyncpa [#allocation4 + $0x1], 0  ;;  %s1689_s13 = smov 0   ;;  %s1691_s14 = smov 0  }
   0x4   :  { %s1693_s15 = smov 0   ;;  %s1695_s16 = smov 0  }
   0x5 LB: > { %2014 = sst [smem:[#allocation8_spill]] %s1616_s15  ;;  %s1710_s17 = sadd.s32 4294967295, %s1620_s16   ;;  %s1620_s16 = sphi %s1695_s16, %s2029_s16   ;;  %s1616_s15 = sphi %s1693_s15, %s2031_s15   ;;  %s1612_s14 = sphi %s1691_s14, %s2033_s14   ;;  %s1608_s13 = sphi %s1689_s13, %s2032_s13  }
   0x6   : > { %s1329_s18 = sadd.s32 4294967294, %s1620_s16   ;;  %s1714_s19 = sadd.s32 1, %s1620_s16  }
   0x7   : > { %2015 = sst [smem:[#allocation9_spill]] %s1714_s19  ;;  %s85_s20 = sadd.s32 1, %s1616_s15 }
   0x8   : > { %s82_s21 = ssub.s32 %s1620_s16, %s1714_s19  ;;  %p92_p0 = scmp.ne.s32.totalorder %s1616_s15, %s1612_s14 }
   0x9   : > { %p83_p1 = scmp.eq.s32.totalorder %s82_s21, 0  ;;  %p93_p2 = scmp.eq.s32.totalorder %s1620_s16, 0 }
   0xa   : > { %p98_p3 = scmp.ne.s32.totalorder %s1612_s14, %s1608_s13  ;;  %p99_p4 = scmp.eq.s32.totalorder %s1710_s17, 0 }
   0xb   : > { %s1726_s22 = scalar_select %p83_p1, %s1616_s15, %s85_s20  }
   0xc   : > { %p1728_p5 = por %p93_p2, %p92_p0  ;;  %p1732_p6 = por %p99_p4, %p98_p3 }
   0xd   : > { %2016 = sst [smem:[#allocation10_spill]] %s1726_s22  ;;  %p269_p7 = scmp.eq.s32.totalorder %s1710_s17, 1 }
   0xe   : > { %s2018_s24 = scalar_select %p1732_p6, 1, 0 }
   0xf   : > { %p275_p8 = scmp.eq.s32.totalorder %s1329_s18, 1  ;;  %p1468_p10 = scmp.lt.s32.totalorder %s1620_s16, 2 }
  0x10   : > { %p1739_p11 = por %p269_p7, %p92_p0  ;;  %s330_s27 = sand.u32 1, %s1616_s15  }
  0x11   : > { %p1743_p12 = por %p275_p8, %p98_p3  ;;  %s1333_s28 = sshll.u32 %s1620_s16, 7 }
  0x12   : > { %s2019_s25 = scalar_select %p1739_p11, 1, 0 }
  0x13   : > { %s2020_s26 = scalar_select %p1743_p12, 1, 0 }
  0x14   : > { %s1332_s29 = sshll.u32 %s330_s27, 3  ;;  %s1752_s12 = scalar_lea.hbm %s1999_s2, %s1333_s28 }
  0x15   : > { %s334_s18 = scalar_lea.vmem [#allocation2], %s1332_s29  ;;  %p1756_p13 = pnand %p1468_p10, %p1728_p5 }
  0x16   : > { %s341_s20 = sshll.u32 %s334_s18, 4  ;;  %s331_s22 = scalar_lea.sflag [#allocation3], %s330_s27  ;;  %s1760_s20 = int_to_ptr.vmem [resolvable:$true] %s341_s20 }
  0x17   : > { %s1528_s15 = scalar_lea.hbm %s1752_s12, 128  ;;  %p1530_p3 = pneg %p1756_p13 }
  0x18   : > { %p1529_p2 = scmp.ne.s32.totalorder %s1752_s12, %s1528_s15  ;;  %s1533_s23 = scalar_lea.hbm %s1999_s2, 256 }
  0x19   : > { %p1534_p5 = scmp.lt.s32.totalorder %s1752_s12, %s1999_s2  ;;  %p1535_p8 = scmp.lt.s32.totalorder %s1533_s23, %s1528_s15 }
  0x1a   : > { %p1531_p4 = pnand %p1530_p3, %p1529_p2 }
  0x1b   : > { %p1536_p10 = por %p1535_p8, %p1534_p5 }
  0x1c   : > { %p1532_p7 = pneg %p1531_p4 }
  0x1e   : > { %p1537_p9 = pnand %p1536_p10, %p1532_p7 }
  0x20   : > { %1540 = shalt.err (!%p1537_p9)
}
  0x21   : > { %s1541_s27 = scalar_lea.vmem %s1760_s20, 128  ;;  %s1622_s18 = smov [#allocation2]  }
  0x22   : > { %p1542_p0 = scmp.ne.s32.totalorder %s1760_s20, %s1541_s27  ;;  %s1546_s19 = sshll.u32 %s1622_s18, 4  ;;  %s1547_s19 = int_to_ptr.vmem [resolvable:$false] %s1546_s19 }
  0x23   : > { %s1548_s28 = scalar_lea.vmem %s1547_s19, 256  ;;  %p1549_p4 = scmp.lt.s32.totalorder %s1760_s20, %s1547_s19 }
  0x24   : > { %p1544_p1 = pnand %p1542_p0, %p1530_p3  ;;  %p1550_p12 = scmp.lt.s32.totalorder %s1548_s28, %s1541_s27 }
  0x26   : > { %p1545_p2 = pneg %p1544_p1  ;;  %p1551_p11 = por %p1550_p12, %p1549_p4 }
  0x28   : > { %p1552_p6 = pnand %p1551_p11, %p1545_p2 }
  0x2a   : > { %1555 = shalt.err (!%p1552_p6)
}
  0x2b   : > { %1463 = dma.hbm_to_vmem [thread:$0]  (!%p1756_p13), %s1752_s12, 128, %s1760_s20, %s331_s22  }
  0x2c   : > { %p2022_p9 = scmp.lt.s32.totalorder %s1620_s16, 3  ;;  %p2023_p7 = scmp.ge.s32.totalorder %s1620_s16, 1 }
  0x2e   : > { %p347_p0 = pnand %p2023_p7, %p2022_p9 }
  0x2f   : > { %s1787_s15 = sand.u32 (!%p347_p0), 1, %s1612_s14   ;;  %p2024_p6 = scmp.ne.s32.totalorder (!%p347_p0), %s2018_s24, 0 }
  0x30   : > { %350 = sbr.rel (%p347_p0) target bundleno = 1547 (0x60b), region = 60  ;;  %s2013_s19 = sshll.u32 (!%p347_p0), %s1787_s15, 3 }
  0x31   : > { %s353_s29 = scalar_lea.sflag (!%p347_p0), [#allocation3], %s1787_s15  ;;  %s1793_s21 = scalar_lea.vmem (!%p347_p0), [#allocation2], %s2013_s19 }
  0x35   : > { %1599 = dma.done.wait (%p2024_p6), %s353_s29, 128  }
  0x36   : > { %1601 = vsyncadd (%p2024_p6), %s353_s29, 4294967168  ;;  %p401_p11 = scmp.lt.s32.totalorder %s1710_s17, 1  ;;  %v1623_v0 = vmov 0.0   ;;  %vm1624_vm0 = vmmov 0   ;;  %v415_v1 = vld [vmem:[%s2000_s3 + $0x18] sm:$0xff]  ;;  %v414_v2 = vld [vmem:[%s2000_s3 + $0x10] sm:$0xff] }
  0x37   : > { %1392 = vmatprep.subr.mxu0 %v1623_v0  ;;  %1403 = vmatprep.subr.mxu1 %v1623_v0  ;;  %v500_v3 = vld [vmem:[%s2002_s5 + $0x18] sm:$0xff]  ;;  %v499_v4 = vld [vmem:[%s2002_s5 + $0x10] sm:$0xff]  ;;  %v413_v5 = vld [vmem:[%s2000_s3 + $0x8] sm:$0xff]  ;;  %vm423_vm1 = vcmask 261120   ;;  %s1625_s30 = smov 112   ;;  %s1626_s11 = smov 120  }
  0x38   : > { %1400 = vmatprep.mubr.msk.f32.mxu0 %vm1624_vm0, %v1623_v0  ;;  %s1805_s22 = scalar_select %p401_p11, %s1710_s17, 1  ;;  %1411 = vmatprep.mubr.msk.f32.mxu1 %vm1624_vm0, %v1623_v0  ;;  %v498_v6 = vld [vmem:[%s2002_s5 + $0x8] sm:$0xff]  ;;  %v412_v7 = vld [vmem:[%s2000_s3] sm:$0xff]  ;;  %vm710_vm2 = vcmask 31744   ;;  %vm751_vm3 = vcmask 64512   ;;  %vm1139_vm4 = vcmask 130048  }
  0x39   : > { %1393 = vmatpush3.msra.mxu0 %v415_v1  ;;  %1404 = vmatpush3.msra.mxu1 %v500_v3  ;;  %v497_v9 = vld [vmem:[%s2002_s5] sm:$0xff]  ;;  %s1627_s27 = smov 104   ;;  %s1628_s18 = smov 4   ;;  %vm1141_vm5 = vcmask 195584  }
  0x3a   : > { %s1337_s24 = sshll.u32 %s1805_s22, 3  ;;  %1394 = vmatprep.subr.mxu0 %v1623_v0  ;;  %1405 = vmatprep.subr.mxu1 %v1623_v0  ;;  %v1339_v10 = vld [vmem:[%s2001_s4] ss:$0 sm:$0xff]  ;;  %s1629_s19 = smov 124  }
  0x3b   : > { %s404_s23 = scalar_lea.vmem %s1997_s0, %s1337_s24  ;;  %1395 = vmatpush3.msra.mxu0 %v414_v2  ;;  %1406 = vmatpush3.msra.mxu1 %v499_v4  ;;  %v1341_v15 = vld [vmem:[%s2003_s6] ss:$0 sm:$0xff]  ;;  %s408_s12 = scalar_lea.vmem %s1998_s1, %s1337_s24  ;;  %v581_v4 = vld [vmem:[%s2004_s7 + $0x18] sm:$0xff] }
  0x3c   : > { %1396 = vmatprep.subr.mxu0 %v1623_v0  ;;  %v1839_v8 = vld [vmem:[%s404_s23] sm:$0xff]  ;;  %1407 = vmatprep.subr.mxu1 %v1623_v0  ;;  %s2025_s28 = sshll.u32 %s1787_s15, 3  ;;  %s1222_s24 = scalar_lea.sflag [#allocation4], %s1787_s15 }
  0x3d   : > { %1397 = vmatpush3.msra.mxu0 %v413_v5  ;;  %1408 = vmatpush3.msra.mxu1 %v498_v6  ;;  %v411_v26 = vld [vmem:[%s1793_s21] sm:$0xff]  ;;  %v580_v5 = vld [vmem:[%s2004_s7 + $0x10] sm:$0xff]  ;;  %p2026_p13 = scmp.ne.s32.totalorder %s2019_s25, 0 }
  0x3e   : > { %1398 = vmatprep.subr.mxu0 %v1623_v0  ;;  %1409 = vmatprep.subr.mxu1 %v1623_v0  ;;  %v410_v29 = vld [vmem:[%s408_s12] sm:$0xff]  ;;  %v579_v6 = vld [vmem:[%s2004_s7 + $0x8] sm:$0xff]  ;;  %s1630_s12 = smov 8  }
  0x3f   : > { %1399 = vmatpush3.msra.mxu0 %v412_v7  ;;  %1410 = vmatpush3.msra.mxu1 %v497_v9  ;;  %v578_v7 = vld [vmem:[%s2004_s7] sm:$0xff] }
  0x40   : > { %1401 = vmatmul.mubr.msk.f32.vlgmr.msra.gmra.mxu0 %vm423_vm1, %v1839_v8  ;;  %1412 = vmatmul.mubr.msk.f32.vlgmr.msra.gmra.mxu1 %vm423_vm1, %v1839_v8 }
  0x41   : > { %1414 = vmatprep.subr.mxu0 %v1623_v0  ;;  %1422 = vmatprep.mubr.msk.f32.mxu0 %vm1624_vm0, %v1623_v0 }
  0x42   : > { %1415 = vmatpush3.msra.mxu0 %v581_v4 }
  0x43   : > { %1416 = vmatprep.subr.mxu0 %v1623_v0 }
  0x44   : > { %1417 = vmatpush3.msra.mxu0 %v580_v5 }
  0x45   : > { %1418 = vmatprep.subr.mxu0 %v1623_v0 }
  0x46   : > { %1419 = vmatpush3.msra.mxu0 %v579_v6 }
  0x47   : > { %1420 = vmatprep.subr.mxu0 %v1623_v0 }
  0x48   : > { %1421 = vmatpush3.msra.mxu0 %v578_v7 }
  0x49   : > { %1423 = vmatmul.mubr.msk.f32.vlgmr.msra.gmra.mxu0 %vm423_vm1, %v1839_v8  ;;  %1445 = vmatprep.subr.mxu0 %v1623_v0 }
  0x4a   : > { %1453 = vmatprep.mubr.msk.f32.mxu0 %vm1624_vm0, %v1623_v0 }
 0x100   : > { %v493_v11 = vpop.f32.mrf.mxu0  ;;  %v574_v13 = vpop.f32.mrf.mxu1 }
 0x101   : > { %v494_v12 = vadd.f32 %v1339_v10, %v493_v11  ;;  %v575_v18 = vadd.f32 %v1341_v15, %v574_v13 }
 0x102   : > { %v1402_v14 = vpop.f32.mrf.mxu0  ;;  %v1413_v17 = vpop.f32.mrf.mxu1 }
 0x103   : > { %v659_v16 = vmul.f32 0.35355338, %v494_v12  ;;  %v727_v19 = vsub.f32 0.0, %v575_v18  ;;  %v745_v32 = vmul.f32 %v575_v18, %v410_v29 }
 0x105   : > { %664 = vrot.lane.b32.xlu1 %v659_v16, %s1625_s30  ;;  %661 = vrot.lane.b32.xlu0 %v659_v16, %s1626_s11  ;;  %v678_v20 = vsub.f32 0.0, %v659_v16  ;;  %v715_v39 = vmul.f32 %v659_v16, %v410_v29 }
 0x109   : > { %667 = vrot.lane.b32.xlu1 %v659_v16, %s1627_s27  ;;  %671 = vrot.lane.b32.xlu0 %v575_v18, %s1626_s11  ;;  %v655_v17 = vpop.f32.mrf.mxu0  ;;  %s1631_s27 = smov 16  }
 0x10d   : > { %737 = vrot.lane.b32.xlu1 %v575_v18, %s1628_s18  ;;  %731 = vrot.lane.b32.xlu0 %v727_v19, %s1629_s19  ;;  %v1424_v19 = vpop.f32.mrf.mxu0 }
 0x111   : > { %698 = vrot.lane.b32.xlu1 %v659_v16, %s1628_s18  ;;  %686 = vrot.lane.b32.xlu0 %v678_v20, %s1629_s19  ;;  %v1343_v16 = vld [vmem:[%s2005_s8] ss:$0 sm:$0xff] }
 0x112   : > { %v656_v18 = vadd.f32 %v1343_v16, %v655_v17 }
 0x177   : > { %v665_v21 = vpop.permute.xlu1 %664  ;;  %v662_v22 = vpop.permute.xlu0 %661 }
 0x178   : > { %v679_v30 = vsub.f32 0.0, %v662_v22  ;;  %v680_v37 = vsub.f32 0.0, %v665_v21  ;;  %v716_v52 = vmul.f32 %v662_v22, %v410_v29  ;;  %v717_v58 = vmul.f32 %v665_v21, %v410_v29 }
 0x17b   : > { %v668_v23 = vpop.permute.xlu1 %667  ;;  %v672_v24 = vpop.permute.xlu0 %671 }
 0x17c   : > { %v728_v25 = vsub.f32 0.0, %v672_v24  ;;  %739 = vrot.lane.b32.xlu1 %v672_v24, %s1628_s18  ;;  %v681_v42 = vsub.f32 0.0, %v668_v23  ;;  %v746_v46 = vmul.f32 %v672_v24, %v410_v29  ;;  %v718_v1 = vmul.f32 %v668_v23, %v410_v29 }
 0x17e   : > { %733 = vrot.lane.b32.xlu0 %v728_v25, %s1629_s19 }
 0x17f   : > { %v738_v27 = vpop.permute.xlu1 %737  ;;  %v732_v28 = vpop.permute.xlu0 %731 }
 0x180   : > { %v743_v31 = vsel %vm710_vm2, %v732_v28, %v738_v27  ;;  %700 = vrot.lane.b32.xlu1 %v662_v22, %s1628_s18 }
 0x181   : > { %v747_v33 = vmul.f32 %v743_v31, %v411_v26 }
 0x182   : > { %688 = vrot.lane.b32.xlu0 %v679_v30, %s1629_s19 }
 0x183   : > { %v749_v34 = vadd.f32 %v747_v33, %v745_v32  ;;  %v699_v35 = vpop.permute.xlu1 %698  ;;  %v687_v36 = vpop.permute.xlu0 %686 }
 0x184   : > { %v711_v38 = vsel %vm710_vm2, %v687_v36, %v699_v35  ;;  %702 = vrot.lane.b32.xlu1 %v665_v21, %s1628_s18 }
 0x185   : > { %v719_v40 = vmul.f32 %v711_v38, %v411_v26  ;;  %1425 = vmatprep.subr.msk.mxu1 %vm751_vm3, %v749_v34 }
 0x186   : > { %1426 = vmatpush3.xpose.msk.msra.mxu1 %vm751_vm3, %v749_v34  ;;  %690 = vrot.lane.b32.xlu0 %v680_v37, %s1629_s19 }
 0x187   : > { %v723_v41 = vadd.f32 %v719_v40, %v715_v39 }
 0x188   : > { %704 = vrot.lane.b32.xlu1 %v668_v23, %s1628_s18  ;;  %s1632_s18 = smov 24  }
 0x189   : > { %1427 = vmatprep.mubr.msk.f32.mxu1 %vm751_vm3, %v723_v41 }
 0x18a   : > { %692 = vrot.lane.b32.xlu0 %v681_v42, %s1629_s19  ;;  %s1357_s19 = sshll.u32 %s1710_s17, 7  ;;  %s1633_s17 = smov [#allocation5]  }
 0x18b   : > { %s1953_s22 = scalar_lea.hbm %s2007_s10, %s1357_s19  ;;  %s1560_s23 = sshll.u32 %s1633_s17, 4  ;;  %s1561_s23 = int_to_ptr.vmem [resolvable:$false] %s1560_s23 }
 0x18c   : > { %s1562_s30 = scalar_lea.vmem %s1561_s23, 256 }
 0x1ee   : > { %v740_v43 = vpop.permute.xlu1 %739 }
 0x1f0   : > { %v734_v44 = vpop.permute.xlu0 %733 }
 0x1f1   : > { %v744_v45 = vsel %vm710_vm2, %v734_v44, %v740_v43 }
 0x1f2   : > { %v748_v47 = vmul.f32 %v744_v45, %v411_v26  ;;  %v701_v48 = vpop.permute.xlu1 %700 }
 0x1f4   : > { %v750_v49 = vadd.f32 %v748_v47, %v746_v46  ;;  %v689_v50 = vpop.permute.xlu0 %688 }
 0x1f5   : > { %v712_v51 = vsel %vm710_vm2, %v689_v50, %v701_v48 }
 0x1f6   : > { %v720_v53 = vmul.f32 %v712_v51, %v411_v26  ;;  %v703_v54 = vpop.permute.xlu1 %702  ;;  %1430 = vmatprep.subr.msk.mxu1 %vm751_vm3, %v750_v49 }
 0x1f8   : > { %v724_v55 = vadd.f32 %v720_v53, %v716_v52  ;;  %v691_v56 = vpop.permute.xlu0 %690  ;;  %v1146_v53 = vld [vmem:[%s2006_s9 + $0x18] sm:$0xff] }
 0x1f9   : > { %v713_v57 = vsel %vm710_vm2, %v691_v56, %v703_v54  ;;  %1446 = vmatpush3.msra.mxu0 %v1146_v53  ;;  %v1144_v56 = vld [vmem:[%s2006_s9 + $0x8] sm:$0xff] }
 0x1fa   : > { %v721_v59 = vmul.f32 %v713_v57, %v411_v26  ;;  %1428 = vmatmul.mubr.msk.f32.vlgmr.msra.gmra.mxu1 %vm751_vm3, %v724_v55  ;;  %v705_v61 = vpop.permute.xlu1 %704  ;;  %1447 = vmatprep.subr.mxu0 %v1623_v0  ;;  %v1145_v55 = vld [vmem:[%s2006_s9 + $0x10] sm:$0xff]  ;;  %v1143_v57 = vld [vmem:[%s2006_s9] sm:$0xff] }
 0x1fb   : > { %1431 = vmatpush3.xpose.msk.msra.mxu1 %vm751_vm3, %v750_v49  ;;  %1448 = vmatpush3.msra.mxu0 %v1145_v55 }
 0x1fc   : > { %v725_v60 = vadd.f32 %v721_v59, %v717_v58  ;;  %v693_v62 = vpop.permute.xlu0 %692  ;;  %1435 = vmatprep.subr.mxu1 %v656_v18  ;;  %1449 = vmatprep.subr.mxu0 %v1623_v0 }
 0x1fd   : > { %v714_v63 = vsel %vm710_vm2, %v693_v62, %v705_v61  ;;  %1450 = vmatpush3.msra.mxu0 %v1144_v56 }
 0x1fe   : > { %v722_v2 = vmul.f32 %v714_v63, %v411_v26  ;;  %1432 = vmatprep.mubr.msk.f32.mxu1 %vm751_vm3, %v725_v60  ;;  %1451 = vmatprep.subr.mxu0 %v1623_v0 }
 0x1ff   : > { %1452 = vmatpush3.msra.mxu0 %v1143_v57 }
 0x200   : > { %v726_v3 = vadd.f32 %v722_v2, %v718_v1 }
 0x202   : > { %1433 = vmatmul.mubr.msk.f32.vlgmr.msra.gmra.mxu1 %vm751_vm3, %v726_v3 }
 0x203   : > { %1436 = vmatpush3.msra.mxu1 %v656_v18 }
 0x2ba   : > { %v1429_v9 = vpop.f32.mrf.mxu1 }
 0x2bb   : > { %v923_v10 = vsel %vm751_vm3, %v1429_v9, -inf }
 0x2bc   : > { %924 = vmax.xlane.f32.xlu1 %v923_v10  ;;  %v827_v11 = vpop.f32.mrf.mxu1 }
 0x2bd   : > { %v920_v12 = vsel %vm751_vm3, %v827_v11, -inf }
 0x2be   : > { %921 = vmax.xlane.f32.xlu0 %v920_v12 }
 0x2c2   : > { %v1434_v13 = vpop.f32.mrf.mxu1 }
 0x2c3   : > { %v929_v8 = vsel %vm751_vm3, %v1434_v13, -inf }
 0x2c4   : > { %v911_v14 = vpop.f32.mrf.mxu1 }
 0x2c5   : > { %v926_v15 = vsel %vm751_vm3, %v911_v14, -inf }
 0x2c6   : > { %927 = vmax.xlane.f32.xlu0 %v926_v15 }
 0x2ca   : > { %930 = vmax.xlane.f32.xlu0 %v929_v8 }
 0x345   : > { %v925_v20 = vpop.xlane.xlu1 %924 }
 0x346   : > { %v933_v21 = vsub.f32 %v1429_v9, %v925_v20 }
 0x347   : > { %v922_v22 = vpop.xlane.xlu0 %921 }
 0x348   : > { %v938_v23 = vmul.f32 1.442695, %v933_v21  ;;  %v932_v24 = vsub.f32 %v827_v11, %v922_v22 }
 0x34a   : > { %1512 = vpow2.f32 %v938_v23  ;;  %v936_v25 = vmul.f32 1.442695, %v932_v24 }
 0x34c   : > { %1514 = vpow2.f32 %v936_v25 }
 0x34f   : > { %v928_v26 = vpop.xlane.xlu0 %927 }
 0x350   : > { %v934_v27 = vsub.f32 %v911_v14, %v928_v26 }
 0x352   : > { %v940_v28 = vmul.f32 1.442695, %v934_v27 }
 0x353   : > { %v931_v29 = vpop.xlane.xlu0 %930 }
 0x354   : > { %1516 = vpow2.f32 %v940_v28  ;;  %v935_v30 = vsub.f32 %v1434_v13, %v931_v29 }
 0x356   : > { %v942_v31 = vmul.f32 1.442695, %v935_v30 }
 0x357   : > { %v1513_v32 = vpop.eup %1512 }
 0x358   : > { %1518 = vpow2.f32 %v942_v31  ;;  %v947_v33 = vsel %vm751_vm3, %v1513_v32, 0.0 }
 0x359   : > { %v1515_v34 = vpop.eup %1514  ;;  %948 = vadd.xlane.f32.xlu0 %v947_v33 }
 0x35a   : > { %v944_v35 = vsel %vm751_vm3, %v1515_v34, 0.0 }
 0x35b   : > { %945 = vadd.xlane.f32.xlu1 %v944_v35 }
 0x361   : > { %v1517_v36 = vpop.eup %1516 }
 0x362   : > { %v950_v37 = vsel %vm751_vm3, %v1517_v36, 0.0 }
 0x363   : > { %951 = vadd.xlane.f32.xlu1 %v950_v37 }
 0x365   : > { %v1519_v38 = vpop.eup %1518 }
 0x366   : > { %v953_v39 = vsel %vm751_vm3, %v1519_v38, 0.0 }
 0x367   : > { %954 = vadd.xlane.f32.xlu0 %v953_v39 }
 0x374   : > { %675 = vrot.lane.b32.xlu1 %v656_v18, %s1626_s11  ;;  %s400_s11 = scalar_lea.vmem [#allocation5], %s2025_s28 }
 0x375   : > { %s1235_s29 = sshll.u32 %s400_s11, 4  ;;  %s1955_s29 = int_to_ptr.vmem [resolvable:$true] %s1235_s29 }
 0x376   : > { %s1556_s20 = scalar_lea.vmem %s1955_s29, 128  ;;  %p1563_p5 = scmp.lt.s32.totalorder %s1955_s29, %s1561_s23 }
 0x377   : > { %p1557_p12 = scmp.ne.s32.totalorder %s1955_s29, %s1556_s20  ;;  %p1564_p8 = scmp.lt.s32.totalorder %s1562_s30, %s1556_s20 }
 0x379   : > { %p1558_p1 = pnand %p1557_p12, %p2026_p13  ;;  %p1565_p10 = por %p1564_p8, %p1563_p5 }
 0x37b   : > { %p1559_p3 = pneg %p1558_p1 }
 0x37d   : > { %p1566_p2 = pnand %p1565_p10, %p1559_p3 }
 0x3e2   : > { %v949_v40 = vpop.xlane.xlu0 %948 }
 0x3e3   : > { %1520 = vrcp.f32 %v949_v40 }
 0x3e4   : > { %v946_v41 = vpop.xlane.xlu1 %945 }
 0x3e5   : > { %1522 = vrcp.f32 %v946_v41 }
 0x3ec   : > { %v952_v42 = vpop.xlane.xlu1 %951 }
 0x3ed   : > { %1524 = vrcp.f32 %v952_v42 }
 0x3f0   : > { %v955_v43 = vpop.xlane.xlu0 %954  ;;  %v676_v44 = vpop.permute.xlu1 %675 }
 0x3f1   : > { %v1521_v45 = vpop.eup %1520  ;;  %1526 = vrcp.f32 %v955_v43  ;;  %1440 = vmatprep.subr.mxu1 %v676_v44 }
 0x3f2   : > { %v1523_v46 = vpop.eup %1522  ;;  %v961_v48 = vmul.f32 %v1521_v45, %v1513_v32 }
 0x3f3   : > { %v960_v47 = vmul.f32 %v1523_v46, %v1515_v34 }
 0x3f5   : > { %1437 = vmatprep.mubr.msk.f32.mxu1 %vm751_vm3, %v960_v47 }
 0x3f6   : > { %1438 = vmatmul.mubr.msk.f32.vlgmr.msra.gmra.mxu1 %vm751_vm3, %v961_v48 }
 0x3f7   : > { %1441 = vmatpush3.msra.mxu1 %v676_v44 }
 0x3fa   : > { %v1525_v49 = vpop.eup %1524 }
 0x3fb   : > { %v962_v50 = vmul.f32 %v1525_v49, %v1517_v36 }
 0x3fd   : > { %1442 = vmatprep.mubr.msk.f32.mxu1 %vm751_vm3, %v962_v50 }
 0x3fe   : > { %v1527_v51 = vpop.eup %1526 }
 0x3ff   : > { %v963_v52 = vmul.f32 %v1527_v51, %v1519_v38 }
 0x401   : > { %1443 = vmatmul.mubr.msk.f32.vlgmr.msra.gmra.mxu1 %vm751_vm3, %v963_v52 }
 0x4b6   : > { %v1439_v54 = vpop.f32.mrf.mxu1 }
 0x4b7   : > { %1127 = vrot.lane.b32.xlu0 %v1439_v54, %s1630_s12 }
 0x4b8   : > { %v1036_v58 = vpop.f32.mrf.mxu1 }
 0x4c1   : > { %v1444_v59 = vpop.f32.mrf.mxu1 }
 0x4c3   : > { %v1117_v60 = vpop.f32.mrf.mxu1 }
 0x4c4   : > { %1131 = vrot.lane.b32.xlu1 %v1117_v60, %s1631_s27 }
 0x4c8   : > { %1135 = vrot.lane.b32.xlu1 %v1444_v59, %s1632_s18 }
 0x529   : > { %v1128_v61 = vpop.permute.xlu0 %1127 }
 0x52a   : > { %v1138_v0 = vsel %vm751_vm3, %v1036_v58, %v1128_v61 }
 0x536   : > { %v1132_v62 = vpop.permute.xlu1 %1131 }
 0x537   : > { %v1140_v63 = vsel %vm1139_vm4, %v1138_v0, %v1132_v62 }
 0x53a   : > { %v1136_v1 = vpop.permute.xlu1 %1135 }
 0x53b   : > { %v1142_v2 = vsel %vm1141_vm5, %v1140_v63, %v1136_v1 }
 0x53c   : > { %1454 = vmatmul.mubr.msk.f32.vlgmr.msra.gmra.mxu0 %vm423_vm1, %v1142_v2 }
 0x5fc   : > { %v1216_v3 = vpop.f32.mrf.mxu0 }
 0x5fd   : > { %1220 = vst.msk [vmem:[%s400_s11] sm:$0xff] %vm423_vm1, %v1216_v3 }
 0x5fe   : > { %v1455_v4 = vpop.f32.mrf.mxu0 }
 0x5ff   : > { %1569 = shalt.err (!%p1566_p2)
}
 0x600   : > { %s1570_s27 = scalar_lea.hbm %s1953_s22, 128  ;;  %s1574_s19 = scalar_lea.hbm %s2007_s10, 256 }
 0x601   : > { %p1571_p4 = scmp.ne.s32.totalorder %s1953_s22, %s1570_s27  ;;  %p1575_p0 = scmp.lt.s32.totalorder %s1953_s22, %s2007_s10 }
 0x602   : > { %p1576_p6 = scmp.lt.s32.totalorder %s1574_s19, %s1570_s27 }
 0x603   : > { %p1572_p9 = pnand %p1571_p4, %p2026_p13 }
 0x604   : > { %p1577_p11 = por %p1576_p6, %p1575_p0 }
 0x605   : > { %p1573_p7 = pneg %p1572_p9 }
 0x607   : > { %p1578_p12 = pnand %p1577_p11, %p1573_p7 }
 0x609   : > { %1581 = shalt.err (!%p1578_p12)
}
 0x60a   : > { %1458 = dma.vmem_to_hbm [thread:$0]  (%p2026_p13), %s1955_s29, 128, %s1953_s22, %s1222_s24  }
 0x60b PF: > { %s1247_s12 = sand.u32 1, %s1608_s13   ;;  %p2027_p1 = scmp.ne.s32.totalorder %s2020_s26, 0 }
 0x60c   : > { %p2028_p3 = scmp.ge.s32.totalorder %s1620_s16, 2  ;;  %s1248_s21 = scalar_lea.sflag [#allocation4], %s1247_s12 }
 0x60e   : > { %p1465_p5 = pnand %p2028_p3, %p2027_p1 }
 0x610   : > { %p1466_p8 = pneg %p1465_p5 }
 0x612   : > { %1603 = dma.done.wait (%p1466_p8), %s1248_s21, 128  }
 0x613   : > { %1605 = vsyncadd (%p1466_p8), %s1248_s21, 4294967168  ;;  %s2029_s16 = sld [smem:[#allocation9_spill]]  ;;  %s2032_s13 = smov %s1612_s14 }
 0x614   : > { %s2030_s20 = sld [smem:[#allocation8_spill]] }
 0x615   : > { %s2031_s15 = sld [smem:[#allocation10_spill]] }
 0x619   : > { %p23_p10 = scmp.ge.s32.totalorder %s2029_s16, 4  }
 0x61a   : > { %s2033_s14 = smov %s2030_s20 }
 0x61b   :  { %25 = sbr.rel (!%p23_p10) target bundleno = 5 (0x5), region = 111 }
 0x620   :  { %1253 = vsyncpa [#allocation3], 1 }
 0x621   :  { %1255 = vsyncpa [#allocation3 + $0x1], 1 }
 0x622   :  { %1256 = vsyncpa [#allocation4], 1 }
 0x623   :  { %1258 = vsyncpa [#allocation4 + $0x1], 1 }

</bundles_post_ra>
